<compile_context>
chip_gen: v6e
topology: v6e:2x2x1
jax: 0.10.0
libtpu: 0.0.40
codegen_flags: <defaults>
</compile_context>

<pallas_src>
import jax
import jax.numpy as jnp
import numpy as np
from jax.experimental import pallas as pl
from jax.experimental.pallas import tpu as pltpu


def _make_rnn_fc_kernel(num_layers, seq_len, batch, input_dim, hidden_dim):
    """Kernel refs: [x2d, (w_ih_t, w_hh_t, bias) * L, w_fc_t, b_fc, out, proj_scr, hid_scr]."""

    def kernel(*refs):
        x_ref = refs[0]
        layer_refs = refs[1:1 + 3 * num_layers]
        w_fc_ref = refs[1 + 3 * num_layers]
        b_fc_ref = refs[2 + 3 * num_layers]
        o_ref = refs[3 + 3 * num_layers]
        proj_ref = refs[4 + 3 * num_layers]      # VMEM scratch (S*B, H)
        hid_ref = refs[5 + 3 * num_layers]       # VMEM scratch (S*B, H)

        for l in range(num_layers):
            w_ih = layer_refs[3 * l + 0][...]    # (in_l, H)
            w_hh = layer_refs[3 * l + 1][...]    # (H, H)
            bias = layer_refs[3 * l + 2][...]    # (1, H) = b_ih + b_hh, broadcast once/layer

            # Full-sequence input projection hoisted out of the time loop:
            # one (S*B, in_l) x (in_l, H) matmul per layer.
            src = x_ref[...] if l == 0 else hid_ref[...]
            proj_ref[...] = (
                jnp.dot(src, w_ih, preferred_element_type=jnp.float32) + bias)

            # Recurrence: only one matmul per cell, reading proj from scratch.
            h = jnp.zeros((batch, hidden_dim), jnp.float32)
            # S is small here, so a static unroll is fine.
            # TODO(synk): switch to lax.fori_loop(..., unroll=2) with pl.ds /
            # pl.multiple_of slicing once seq_len grows beyond a few dozen steps.
            for t in range(seq_len):
                z = (proj_ref[t * batch:(t + 1) * batch, :]
                     + jnp.dot(h, w_hh, preferred_element_type=jnp.float32))
                h = jnp.tanh(z)
                hid_ref[t * batch:(t + 1) * batch, :] = h

        # FC head: one batched matmul over the last layer's full hidden slab.
        fc = (jnp.dot(hid_ref[...], w_fc_ref[...],
                      preferred_element_type=jnp.float32) + b_fc_ref[...])
        o_ref[...] = fc.astype(o_ref.dtype)

    return kernel


def rnn_fc_forward(x, params, num_layers):
    """x: (B, S, I) float32 (batch_first, like PyTorch). Returns (B, S, H)."""
    B, S, I = x.shape
    H = params["w_fc"].shape[0]

    # t-major row layout: row t*B + b == x[b, t, :] (transpose done by XLA in
    # the wrapper, so the kernel sees contiguous per-timestep row blocks).
    x2d = jnp.transpose(x, (1, 0, 2)).reshape(S * B, I)

    args = [x2d]
    for l in range(num_layers):
        args += [
            params[f"w_ih_{l}"].T,                                      # (in_l, H)
            params[f"w_hh_{l}"].T,                                      # (H, H)
            (params[f"b_ih_{l}"] + params[f"b_hh_{l}"]).reshape(1, H),  # pre-summed bias
        ]
    args += [params["w_fc"].T, params["b_fc"].reshape(1, H)]

    # Advisory cost estimate (latency-bound serial matmul chain).
    flops = 2 * S * B * H * (I + (num_layers - 1) * H + num_layers * H + H)
    bytes_accessed = sum(int(np.prod(a.shape)) * 4 for a in args) + S * B * H * 4
    cost = pl.CostEstimate(flops=flops,
                           transcendentals=S * B * H * num_layers,
                           bytes_accessed=bytes_accessed)

    # Single invocation, no grid: whole problem fits in VMEM as full blocks.
    out_slab = pl.pallas_call(
        _make_rnn_fc_kernel(num_layers, S, B, I, H),
        out_shape=jax.ShapeDtypeStruct((S * B, H), jnp.float32),
        in_specs=[pl.BlockSpec(memory_space=pltpu.MemorySpace.VMEM)] * len(args),
        out_specs=pl.BlockSpec(memory_space=pltpu.MemorySpace.VMEM),
        scratch_shapes=[pltpu.VMEM((S * B, H), jnp.float32),   # proj slab
                        pltpu.VMEM((S * B, H), jnp.float32)],  # hidden slab
        cost_estimate=cost,
    )(*args)

    # Row t*B + b  ->  (b, t).  Cheap wrapper-side transpose (H < 128 lanes, so
    # an in-kernel (B, S*H) repack would be cross-lane shuffle work).
    return out_slab.reshape(S, B, H).transpose(1, 0, 2)


def ref_forward(x, params, num_layers):
    """Pure-JAX reference mirroring torch.nn.RNN(tanh, batch_first) + Linear."""
    B, S, I = x.shape
    H = params["w_fc"].shape[0]
    h = [jnp.zeros((B, H), jnp.float32) for _ in range(num_layers)]
    outs = []
    for t in range(S):
        inp = x[:, t, :]
        for l in range(num_layers):
            z = (inp @ params[f"w_ih_{l}"].T + params[f"b_ih_{l}"]
                 + h[l] @ params[f"w_hh_{l}"].T + params[f"b_hh_{l}"])
            h[l] = jnp.tanh(z)
            inp = h[l]
        outs.append(inp @ params["w_fc"].T + params["b_fc"])
    return jnp.stack(outs, axis=1)


def init_params(key, input_dim, hidden_dim, num_layers):
    """Deterministic init mimicking PyTorch's U(-1/sqrt(H), 1/sqrt(H))."""
    bound = 1.0 / np.sqrt(hidden_dim)
    params = {}
    for l in range(num_layers):
        in_dim = input_dim if l == 0 else hidden_dim
        key, k1, k2, k3, k4 = jax.random.split(key, 5)
        params[f"w_ih_{l}"] = jax.random.uniform(k1, (hidden_dim, in_dim), jnp.float32, -bound, bound)
        params[f"w_hh_{l}"] = jax.random.uniform(k2, (hidden_dim, hidden_dim), jnp.float32, -bound, bound)
        params[f"b_ih_{l}"] = jax.random.uniform(k3, (hidden_dim,), jnp.float32, -bound, bound)
        params[f"b_hh_{l}"] = jax.random.uniform(k4, (hidden_dim,), jnp.float32, -bound, bound)
    key, k1, k2 = jax.random.split(key, 3)
    params["w_fc"] = jax.random.uniform(k1, (hidden_dim, hidden_dim), jnp.float32, -bound, bound)
    params["b_fc"] = jax.random.uniform(k2, (hidden_dim,), jnp.float32, -bound, bound)
    return params


if __name__ == "__main__":
    B, S, I, H, L = 2, 8, 16, 32, 2   # batch, seq, input_dim (one-hot dict size), hidden, layers

    key = jax.random.PRNGKey(0)
    key, kx = jax.random.split(key)
    # x_data would be one-hot rows of size I; any float32 input exercises the same math.
    x = jax.random.normal(kx, (B, S, I), jnp.float32)

    params = init_params(key, I, H, L)

    out = rnn_fc_forward(x, params, L)
    out = jax.block_until_ready(out)

    expected = ref_forward(x, params, L)
    np.testing.assert_allclose(np.asarray(out), np.asarray(expected), atol=2e-5, rtol=2e-5)

    print("KERNEL_OK")
</pallas_src>

<mosaic_0001>
module attributes {stable_mosaic.version = 11 : i64} {
  func.func @kernel(%arg0: memref<16x16xf32, #tpu.memory_space<vmem>>, %arg1: memref<16x32xf32, #tpu.memory_space<vmem>>, %arg2: memref<32x32xf32, #tpu.memory_space<vmem>>, %arg3: memref<1x32xf32, #tpu.memory_space<vmem>>, %arg4: memref<32x32xf32, #tpu.memory_space<vmem>>, %arg5: memref<32x32xf32, #tpu.memory_space<vmem>>, %arg6: memref<1x32xf32, #tpu.memory_space<vmem>>, %arg7: memref<32x32xf32, #tpu.memory_space<vmem>>, %arg8: memref<1x32xf32, #tpu.memory_space<vmem>>, %arg9: memref<16x32xf32, #tpu.memory_space<vmem>>, %arg10: memref<16x32xf32, #tpu.memory_space<vmem>>, %arg11: memref<16x32xf32, #tpu.memory_space<vmem>>) attributes {dimension_semantics = [], scalar_prefetch = 0 : i64, scratch_operands = 2 : i64, tpu.core_type = #tpu.core_type<tc>} {
    %c0 = arith.constant 0 : index
    %c0_0 = arith.constant 0 : index
    %0 = vector.load %arg1[%c0, %c0_0] : memref<16x32xf32, #tpu.memory_space<vmem>>, vector<16x32xf32>
    %c0_1 = arith.constant 0 : index
    %c0_2 = arith.constant 0 : index
    %1 = vector.load %arg2[%c0_1, %c0_2] : memref<32x32xf32, #tpu.memory_space<vmem>>, vector<32x32xf32>
    %c0_3 = arith.constant 0 : index
    %c0_4 = arith.constant 0 : index
    %2 = vector.load %arg3[%c0_3, %c0_4] : memref<1x32xf32, #tpu.memory_space<vmem>>, vector<1x32xf32>
    %c0_5 = arith.constant 0 : index
    %c0_6 = arith.constant 0 : index
    %3 = vector.load %arg0[%c0_5, %c0_6] : memref<16x16xf32, #tpu.memory_space<vmem>>, vector<16x16xf32>
    %cst = arith.constant dense<0.000000e+00> : vector<16x32xf32>
    %4 = tpu.matmul %3, %0, %cst {dimension_numbers = #tpu.dot_dimension_numbers<[1], [0], [0], [1], [0, 0, 1, 1], [], []>} : vector<16x16xf32>, vector<16x32xf32>, vector<16x32xf32> -> vector<16x32xf32>
    %5 = vector.broadcast %2 : vector<1x32xf32> to vector<16x32xf32>
    %6 = arith.addf %4, %5 : vector<16x32xf32>
    %c0_7 = arith.constant 0 : index
    %c0_8 = arith.constant 0 : index
    %7 = vector.load %arg10[%c0_7, %c0_8] : memref<16x32xf32, #tpu.memory_space<vmem>>, vector<16x32xf32>
    tpu.vector_store %arg10[%c0_7, %c0_8], %6 {strides = array<i32>} : memref<16x32xf32, #tpu.memory_space<vmem>>, vector<16x32xf32>,
    %cst_9 = arith.constant 0.000000e+00 : f32
    %8 = vector.broadcast %cst_9 : f32 to vector<2x32xf32>
    %c0_10 = arith.constant 0 : index
    %c0_11 = arith.constant 0 : index
    %9 = vector.load %arg10[%c0_10, %c0_11] : memref<16x32xf32, #tpu.memory_space<vmem>>, vector<2x32xf32>
    %cst_12 = arith.constant dense<0.000000e+00> : vector<2x32xf32>
    %10 = tpu.matmul %8, %1, %cst_12 {dimension_numbers = #tpu.dot_dimension_numbers<[1], [0], [0], [1], [0, 0, 1, 1], [], []>} : vector<2x32xf32>, vector<32x32xf32>, vector<2x32xf32> -> vector<2x32xf32>
    %11 = arith.addf %9, %10 : vector<2x32xf32>
    %12 = math.tanh %11 : vector<2x32xf32>
    %c0_13 = arith.constant 0 : index
    %c0_14 = arith.constant 0 : index
    %13 = vector.load %arg11[%c0_13, %c0_14] : memref<16x32xf32, #tpu.memory_space<vmem>>, vector<2x32xf32>
    tpu.vector_store %arg11[%c0_13, %c0_14], %12 {strides = array<i32>} : memref<16x32xf32, #tpu.memory_space<vmem>>, vector<2x32xf32>,
    %c2 = arith.constant 2 : index
    %c0_15 = arith.constant 0 : index
    %14 = vector.load %arg10[%c2, %c0_15] : memref<16x32xf32, #tpu.memory_space<vmem>>, vector<2x32xf32>
    %cst_16 = arith.constant dense<0.000000e+00> : vector<2x32xf32>
    %15 = tpu.matmul %12, %1, %cst_16 {dimension_numbers = #tpu.dot_dimension_numbers<[1], [0], [0], [1], [0, 0, 1, 1], [], []>} : vector<2x32xf32>, vector<32x32xf32>, vector<2x32xf32> -> vector<2x32xf32>
    %16 = arith.addf %14, %15 : vector<2x32xf32>
    %17 = math.tanh %16 : vector<2x32xf32>
    %c2_17 = arith.constant 2 : index
    %c0_18 = arith.constant 0 : index
    %18 = vector.load %arg11[%c2_17, %c0_18] : memref<16x32xf32, #tpu.memory_space<vmem>>, vector<2x32xf32>
    tpu.vector_store %arg11[%c2_17, %c0_18], %17 {strides = array<i32>} : memref<16x32xf32, #tpu.memory_space<vmem>>, vector<2x32xf32>,
    %c4 = arith.constant 4 : index
    %c0_19 = arith.constant 0 : index
    %19 = vector.load %arg10[%c4, %c0_19] : memref<16x32xf32, #tpu.memory_space<vmem>>, vector<2x32xf32>
    %cst_20 = arith.constant dense<0.000000e+00> : vector<2x32xf32>
    %20 = tpu.matmul %17, %1, %cst_20 {dimension_numbers = #tpu.dot_dimension_numbers<[1], [0], [0], [1], [0, 0, 1, 1], [], []>} : vector<2x32xf32>, vector<32x32xf32>, vector<2x32xf32> -> vector<2x32xf32>
    %21 = arith.addf %19, %20 : vector<2x32xf32>
    %22 = math.tanh %21 : vector<2x32xf32>
    %c4_21 = arith.constant 4 : index
    %c0_22 = arith.constant 0 : index
    %23 = vector.load %arg11[%c4_21, %c0_22] : memref<16x32xf32, #tpu.memory_space<vmem>>, vector<2x32xf32>
    tpu.vector_store %arg11[%c4_21, %c0_22], %22 {strides = array<i32>} : memref<16x32xf32, #tpu.memory_space<vmem>>, vector<2x32xf32>,
    %c6 = arith.constant 6 : index
    %c0_23 = arith.constant 0 : index
    %24 = vector.load %arg10[%c6, %c0_23] : memref<16x32xf32, #tpu.memory_space<vmem>>, vector<2x32xf32>
    %cst_24 = arith.constant dense<0.000000e+00> : vector<2x32xf32>
    %25 = tpu.matmul %22, %1, %cst_24 {dimension_numbers = #tpu.dot_dimension_numbers<[1], [0], [0], [1], [0, 0, 1, 1], [], []>} : vector<2x32xf32>, vector<32x32xf32>, vector<2x32xf32> -> vector<2x32xf32>
    %26 = arith.addf %24, %25 : vector<2x32xf32>
    %27 = math.tanh %26 : vector<2x32xf32>
    %c6_25 = arith.constant 6 : index
    %c0_26 = arith.constant 0 : index
    %28 = vector.load %arg11[%c6_25, %c0_26] : memref<16x32xf32, #tpu.memory_space<vmem>>, vector<2x32xf32>
    tpu.vector_store %arg11[%c6_25, %c0_26], %27 {strides = array<i32>} : memref<16x32xf32, #tpu.memory_space<vmem>>, vector<2x32xf32>,
    %c8 = arith.constant 8 : index
    %c0_27 = arith.constant 0 : index
    %29 = vector.load %arg10[%c8, %c0_27] : memref<16x32xf32, #tpu.memory_space<vmem>>, vector<2x32xf32>
    %cst_28 = arith.constant dense<0.000000e+00> : vector<2x32xf32>
    %30 = tpu.matmul %27, %1, %cst_28 {dimension_numbers = #tpu.dot_dimension_numbers<[1], [0], [0], [1], [0, 0, 1, 1], [], []>} : vector<2x32xf32>, vector<32x32xf32>, vector<2x32xf32> -> vector<2x32xf32>
    %31 = arith.addf %29, %30 : vector<2x32xf32>
    %32 = math.tanh %31 : vector<2x32xf32>
    %c8_29 = arith.constant 8 : index
    %c0_30 = arith.constant 0 : index
    %33 = vector.load %arg11[%c8_29, %c0_30] : memref<16x32xf32, #tpu.memory_space<vmem>>, vector<2x32xf32>
    tpu.vector_store %arg11[%c8_29, %c0_30], %32 {strides = array<i32>} : memref<16x32xf32, #tpu.memory_space<vmem>>, vector<2x32xf32>,
    %c10 = arith.constant 10 : index
    %c0_31 = arith.constant 0 : index
    %34 = vector.load %arg10[%c10, %c0_31] : memref<16x32xf32, #tpu.memory_space<vmem>>, vector<2x32xf32>
    %cst_32 = arith.constant dense<0.000000e+00> : vector<2x32xf32>
    %35 = tpu.matmul %32, %1, %cst_32 {dimension_numbers = #tpu.dot_dimension_numbers<[1], [0], [0], [1], [0, 0, 1, 1], [], []>} : vector<2x32xf32>, vector<32x32xf32>, vector<2x32xf32> -> vector<2x32xf32>
    %36 = arith.addf %34, %35 : vector<2x32xf32>
    %37 = math.tanh %36 : vector<2x32xf32>
    %c10_33 = arith.constant 10 : index
    %c0_34 = arith.constant 0 : index
    %38 = vector.load %arg11[%c10_33, %c0_34] : memref<16x32xf32, #tpu.memory_space<vmem>>, vector<2x32xf32>
    tpu.vector_store %arg11[%c10_33, %c0_34], %37 {strides = array<i32>} : memref<16x32xf32, #tpu.memory_space<vmem>>, vector<2x32xf32>,
    %c12 = arith.constant 12 : index
    %c0_35 = arith.constant 0 : index
    %39 = vector.load %arg10[%c12, %c0_35] : memref<16x32xf32, #tpu.memory_space<vmem>>, vector<2x32xf32>
    %cst_36 = arith.constant dense<0.000000e+00> : vector<2x32xf32>
    %40 = tpu.matmul %37, %1, %cst_36 {dimension_numbers = #tpu.dot_dimension_numbers<[1], [0], [0], [1], [0, 0, 1, 1], [], []>} : vector<2x32xf32>, vector<32x32xf32>, vector<2x32xf32> -> vector<2x32xf32>
    %41 = arith.addf %39, %40 : vector<2x32xf32>
    %42 = math.tanh %41 : vector<2x32xf32>
    %c12_37 = arith.constant 12 : index
    %c0_38 = arith.constant 0 : index
    %43 = vector.load %arg11[%c12_37, %c0_38] : memref<16x32xf32, #tpu.memory_space<vmem>>, vector<2x32xf32>
    tpu.vector_store %arg11[%c12_37, %c0_38], %42 {strides = array<i32>} : memref<16x32xf32, #tpu.memory_space<vmem>>, vector<2x32xf32>,
    %c14 = arith.constant 14 : index
    %c0_39 = arith.constant 0 : index
    %44 = vector.load %arg10[%c14, %c0_39] : memref<16x32xf32, #tpu.memory_space<vmem>>, vector<2x32xf32>
    %cst_40 = arith.constant dense<0.000000e+00> : vector<2x32xf32>
    %45 = tpu.matmul %42, %1, %cst_40 {dimension_numbers = #tpu.dot_dimension_numbers<[1], [0], [0], [1], [0, 0, 1, 1], [], []>} : vector<2x32xf32>, vector<32x32xf32>, vector<2x32xf32> -> vector<2x32xf32>
    %46 = arith.addf %44, %45 : vector<2x32xf32>
    %47 = math.tanh %46 : vector<2x32xf32>
    %c14_41 = arith.constant 14 : index
    %c0_42 = arith.constant 0 : index
    %48 = vector.load %arg11[%c14_41, %c0_42] : memref<16x32xf32, #tpu.memory_space<vmem>>, vector<2x32xf32>
    tpu.vector_store %arg11[%c14_41, %c0_42], %47 {strides = array<i32>} : memref<16x32xf32, #tpu.memory_space<vmem>>, vector<2x32xf32>,
    %c0_43 = arith.constant 0 : index
    %c0_44 = arith.constant 0 : index
    %49 = vector.load %arg4[%c0_43, %c0_44] : memref<32x32xf32, #tpu.memory_space<vmem>>, vector<32x32xf32>
    %c0_45 = arith.constant 0 : index
    %c0_46 = arith.constant 0 : index
    %50 = vector.load %arg5[%c0_45, %c0_46] : memref<32x32xf32, #tpu.memory_space<vmem>>, vector<32x32xf32>
    %c0_47 = arith.constant 0 : index
    %c0_48 = arith.constant 0 : index
    %51 = vector.load %arg6[%c0_47, %c0_48] : memref<1x32xf32, #tpu.memory_space<vmem>>, vector<1x32xf32>
    %c0_49 = arith.constant 0 : index
    %c0_50 = arith.constant 0 : index
    %52 = vector.load %arg11[%c0_49, %c0_50] : memref<16x32xf32, #tpu.memory_space<vmem>>, vector<16x32xf32>
    %cst_51 = arith.constant dense<0.000000e+00> : vector<16x32xf32>
    %53 = tpu.matmul %52, %49, %cst_51 {dimension_numbers = #tpu.dot_dimension_numbers<[1], [0], [0], [1], [0, 0, 1, 1], [], []>} : vector<16x32xf32>, vector<32x32xf32>, vector<16x32xf32> -> vector<16x32xf32>
    %54 = vector.broadcast %51 : vector<1x32xf32> to vector<16x32xf32>
    %55 = arith.addf %53, %54 : vector<16x32xf32>
    %c0_52 = arith.constant 0 : index
    %c0_53 = arith.constant 0 : index
    %56 = vector.load %arg10[%c0_52, %c0_53] : memref<16x32xf32, #tpu.memory_space<vmem>>, vector<16x32xf32>
    tpu.vector_store %arg10[%c0_52, %c0_53], %55 {strides = array<i32>} : memref<16x32xf32, #tpu.memory_space<vmem>>, vector<16x32xf32>,
    %cst_54 = arith.constant 0.000000e+00 : f32
    %57 = vector.broadcast %cst_54 : f32 to vector<2x32xf32>
    %c0_55 = arith.constant 0 : index
    %c0_56 = arith.constant 0 : index
    %58 = vector.load %arg10[%c0_55, %c0_56] : memref<16x32xf32, #tpu.memory_space<vmem>>, vector<2x32xf32>
    %cst_57 = arith.constant dense<0.000000e+00> : vector<2x32xf32>
    %59 = tpu.matmul %57, %50, %cst_57 {dimension_numbers = #tpu.dot_dimension_numbers<[1], [0], [0], [1], [0, 0, 1, 1], [], []>} : vector<2x32xf32>, vector<32x32xf32>, vector<2x32xf32> -> vector<2x32xf32>
    %60 = arith.addf %58, %59 : vector<2x32xf32>
    %61 = math.tanh %60 : vector<2x32xf32>
    %c0_58 = arith.constant 0 : index
    %c0_59 = arith.constant 0 : index
    %62 = vector.load %arg11[%c0_58, %c0_59] : memref<16x32xf32, #tpu.memory_space<vmem>>, vector<2x32xf32>
    tpu.vector_store %arg11[%c0_58, %c0_59], %61 {strides = array<i32>} : memref<16x32xf32, #tpu.memory_space<vmem>>, vector<2x32xf32>,
    %c2_60 = arith.constant 2 : index
    %c0_61 = arith.constant 0 : index
    %63 = vector.load %arg10[%c2_60, %c0_61] : memref<16x32xf32, #tpu.memory_space<vmem>>, vector<2x32xf32>
    %cst_62 = arith.constant dense<0.000000e+00> : vector<2x32xf32>
    %64 = tpu.matmul %61, %50, %cst_62 {dimension_numbers = #tpu.dot_dimension_numbers<[1], [0], [0], [1], [0, 0, 1, 1], [], []>} : vector<2x32xf32>, vector<32x32xf32>, vector<2x32xf32> -> vector<2x32xf32>
    %65 = arith.addf %63, %64 : vector<2x32xf32>
    %66 = math.tanh %65 : vector<2x32xf32>
    %c2_63 = arith.constant 2 : index
    %c0_64 = arith.constant 0 : index
    %67 = vector.load %arg11[%c2_63, %c0_64] : memref<16x32xf32, #tpu.memory_space<vmem>>, vector<2x32xf32>
    tpu.vector_store %arg11[%c2_63, %c0_64], %66 {strides = array<i32>} : memref<16x32xf32, #tpu.memory_space<vmem>>, vector<2x32xf32>,
    %c4_65 = arith.constant 4 : index
    %c0_66 = arith.constant 0 : index
    %68 = vector.load %arg10[%c4_65, %c0_66] : memref<16x32xf32, #tpu.memory_space<vmem>>, vector<2x32xf32>
    %cst_67 = arith.constant dense<0.000000e+00> : vector<2x32xf32>
    %69 = tpu.matmul %66, %50, %cst_67 {dimension_numbers = #tpu.dot_dimension_numbers<[1], [0], [0], [1], [0, 0, 1, 1], [], []>} : vector<2x32xf32>, vector<32x32xf32>, vector<2x32xf32> -> vector<2x32xf32>
    %70 = arith.addf %68, %69 : vector<2x32xf32>
    %71 = math.tanh %70 : vector<2x32xf32>
    %c4_68 = arith.constant 4 : index
    %c0_69 = arith.constant 0 : index
    %72 = vector.load %arg11[%c4_68, %c0_69] : memref<16x32xf32, #tpu.memory_space<vmem>>, vector<2x32xf32>
    tpu.vector_store %arg11[%c4_68, %c0_69], %71 {strides = array<i32>} : memref<16x32xf32, #tpu.memory_space<vmem>>, vector<2x32xf32>,
    %c6_70 = arith.constant 6 : index
    %c0_71 = arith.constant 0 : index
    %73 = vector.load %arg10[%c6_70, %c0_71] : memref<16x32xf32, #tpu.memory_space<vmem>>, vector<2x32xf32>
    %cst_72 = arith.constant dense<0.000000e+00> : vector<2x32xf32>
    %74 = tpu.matmul %71, %50, %cst_72 {dimension_numbers = #tpu.dot_dimension_numbers<[1], [0], [0], [1], [0, 0, 1, 1], [], []>} : vector<2x32xf32>, vector<32x32xf32>, vector<2x32xf32> -> vector<2x32xf32>
    %75 = arith.addf %73, %74 : vector<2x32xf32>
    %76 = math.tanh %75 : vector<2x32xf32>
    %c6_73 = arith.constant 6 : index
    %c0_74 = arith.constant 0 : index
    %77 = vector.load %arg11[%c6_73, %c0_74] : memref<16x32xf32, #tpu.memory_space<vmem>>, vector<2x32xf32>
    tpu.vector_store %arg11[%c6_73, %c0_74], %76 {strides = array<i32>} : memref<16x32xf32, #tpu.memory_space<vmem>>, vector<2x32xf32>,
    %c8_75 = arith.constant 8 : index
    %c0_76 = arith.constant 0 : index
    %78 = vector.load %arg10[%c8_75, %c0_76] : memref<16x32xf32, #tpu.memory_space<vmem>>, vector<2x32xf32>
    %cst_77 = arith.constant dense<0.000000e+00> : vector<2x32xf32>
    %79 = tpu.matmul %76, %50, %cst_77 {dimension_numbers = #tpu.dot_dimension_numbers<[1], [0], [0], [1], [0, 0, 1, 1], [], []>} : vector<2x32xf32>, vector<32x32xf32>, vector<2x32xf32> -> vector<2x32xf32>
    %80 = arith.addf %78, %79 : vector<2x32xf32>
    %81 = math.tanh %80 : vector<2x32xf32>
    %c8_78 = arith.constant 8 : index
    %c0_79 = arith.constant 0 : index
    %82 = vector.load %arg11[%c8_78, %c0_79] : memref<16x32xf32, #tpu.memory_space<vmem>>, vector<2x32xf32>
    tpu.vector_store %arg11[%c8_78, %c0_79], %81 {strides = array<i32>} : memref<16x32xf32, #tpu.memory_space<vmem>>, vector<2x32xf32>,
    %c10_80 = arith.constant 10 : index
    %c0_81 = arith.constant 0 : index
    %83 = vector.load %arg10[%c10_80, %c0_81] : memref<16x32xf32, #tpu.memory_space<vmem>>, vector<2x32xf32>
    %cst_82 = arith.constant dense<0.000000e+00> : vector<2x32xf32>
    %84 = tpu.matmul %81, %50, %cst_82 {dimension_numbers = #tpu.dot_dimension_numbers<[1], [0], [0], [1], [0, 0, 1, 1], [], []>} : vector<2x32xf32>, vector<32x32xf32>, vector<2x32xf32> -> vector<2x32xf32>
    %85 = arith.addf %83, %84 : vector<2x32xf32>
    %86 = math.tanh %85 : vector<2x32xf32>
    %c10_83 = arith.constant 10 : index
    %c0_84 = arith.constant 0 : index
    %87 = vector.load %arg11[%c10_83, %c0_84] : memref<16x32xf32, #tpu.memory_space<vmem>>, vector<2x32xf32>
    tpu.vector_store %arg11[%c10_83, %c0_84], %86 {strides = array<i32>} : memref<16x32xf32, #tpu.memory_space<vmem>>, vector<2x32xf32>,
    %c12_85 = arith.constant 12 : index
    %c0_86 = arith.constant 0 : index
    %88 = vector.load %arg10[%c12_85, %c0_86] : memref<16x32xf32, #tpu.memory_space<vmem>>, vector<2x32xf32>
    %cst_87 = arith.constant dense<0.000000e+00> : vector<2x32xf32>
    %89 = tpu.matmul %86, %50, %cst_87 {dimension_numbers = #tpu.dot_dimension_numbers<[1], [0], [0], [1], [0, 0, 1, 1], [], []>} : vector<2x32xf32>, vector<32x32xf32>, vector<2x32xf32> -> vector<2x32xf32>
    %90 = arith.addf %88, %89 : vector<2x32xf32>
    %91 = math.tanh %90 : vector<2x32xf32>
    %c12_88 = arith.constant 12 : index
    %c0_89 = arith.constant 0 : index
    %92 = vector.load %arg11[%c12_88, %c0_89] : memref<16x32xf32, #tpu.memory_space<vmem>>, vector<2x32xf32>
    tpu.vector_store %arg11[%c12_88, %c0_89], %91 {strides = array<i32>} : memref<16x32xf32, #tpu.memory_space<vmem>>, vector<2x32xf32>,
    %c14_90 = arith.constant 14 : index
    %c0_91 = arith.constant 0 : index
    %93 = vector.load %arg10[%c14_90, %c0_91] : memref<16x32xf32, #tpu.memory_space<vmem>>, vector<2x32xf32>
    %cst_92 = arith.constant dense<0.000000e+00> : vector<2x32xf32>
    %94 = tpu.matmul %91, %50, %cst_92 {dimension_numbers = #tpu.dot_dimension_numbers<[1], [0], [0], [1], [0, 0, 1, 1], [], []>} : vector<2x32xf32>, vector<32x32xf32>, vector<2x32xf32> -> vector<2x32xf32>
    %95 = arith.addf %93, %94 : vector<2x32xf32>
    %96 = math.tanh %95 : vector<2x32xf32>
    %c14_93 = arith.constant 14 : index
    %c0_94 = arith.constant 0 : index
    %97 = vector.load %arg11[%c14_93, %c0_94] : memref<16x32xf32, #tpu.memory_space<vmem>>, vector<2x32xf32>
    tpu.vector_store %arg11[%c14_93, %c0_94], %96 {strides = array<i32>} : memref<16x32xf32, #tpu.memory_space<vmem>>, vector<2x32xf32>,
    %c0_95 = arith.constant 0 : index
    %c0_96 = arith.constant 0 : index
    %98 = vector.load %arg11[%c0_95, %c0_96] : memref<16x32xf32, #tpu.memory_space<vmem>>, vector<16x32xf32>
    %c0_97 = arith.constant 0 : index
    %c0_98 = arith.constant 0 : index
    %99 = vector.load %arg7[%c0_97, %c0_98] : memref<32x32xf32, #tpu.memory_space<vmem>>, vector<32x32xf32>
    %cst_99 = arith.constant dense<0.000000e+00> : vector<16x32xf32>
    %100 = tpu.matmul %98, %99, %cst_99 {dimension_numbers = #tpu.dot_dimension_numbers<[1], [0], [0], [1], [0, 0, 1, 1], [], []>} : vector<16x32xf32>, vector<32x32xf32>, vector<16x32xf32> -> vector<16x32xf32>
    %c0_100 = arith.constant 0 : index
    %c0_101 = arith.constant 0 : index
    %101 = vector.load %arg8[%c0_100, %c0_101] : memref<1x32xf32, #tpu.memory_space<vmem>>, vector<1x32xf32>
    %102 = vector.broadcast %101 : vector<1x32xf32> to vector<16x32xf32>
    %103 = arith.addf %100, %102 : vector<16x32xf32>
    %c0_102 = arith.constant 0 : index
    %c0_103 = arith.constant 0 : index
    %104 = vector.load %arg9[%c0_102, %c0_103] : memref<16x32xf32, #tpu.memory_space<vmem>>, vector<16x32xf32>
    tpu.vector_store %arg9[%c0_102, %c0_103], %103 {strides = array<i32>} : memref<16x32xf32, #tpu.memory_space<vmem>>, vector<16x32xf32>,
    return
  }
}

</mosaic_0001>

<bundles_post_ra>
// kernel: tpu_custom_call.1
= control target key start
LH: loop header
LB: loop body
LE: loop exit
PB: predicated region body
PF: predicated region fallthrough
CT: control target
= control target key end

     0   :  { %14 = vsyncpa [#allocation5], 0  ;;  %s2510_s0 = inlined_call_operand.hbm [shape: f32[16,16], index: 0, kind: input, shape index: {}]   ;;  %s2511_s1 = inlined_call_operand.hbm [shape: f32[16,32], index: 1, kind: input, shape index: {}]   ;;  %s2512_s2 = inlined_call_operand.hbm [shape: f32[32,32], index: 2, kind: input, shape index: {}]   ;;  %s2513_s3 = inlined_call_operand.vmem [shape: f32[1,32], index: 3, kind: input, shape index: {}]   ;;  %s2514_s4 = inlined_call_operand.hbm [shape: f32[32,32], index: 4, kind: input, shape index: {}]   ;;  %s2515_s5 = inlined_call_operand.hbm [shape: f32[32,32], index: 5, kind: input, shape index: {}]   ;;  %s2516_s6 = inlined_call_operand.vmem [shape: f32[1,32], index: 6, kind: input, shape index: {}]   ;;  %s2517_s7 = inlined_call_operand.hbm [shape: f32[32,32], index: 7, kind: input, shape index: {}]   ;;  %s2518_s8 = inlined_call_operand.vmem [shape: f32[1,32], index: 8, kind: input, shape index: {}]   ;;  %s2519_s9 = inlined_call_operand.hbm [shape: f32[16,32], index: 9, kind: output, shape index: {}]  }
   0x1   :  { %15 = vsyncpa [#allocation8], 0 }
   0x2   :  { %16 = vsyncpa [#allocation11], 0 }
   0x3   :  { %17 = vsyncpa [#allocation14], 0 }
   0x4   :  { %18 = vsyncpa [#allocation6], 0  ;;  %s2178_s30 = smov [#allocation7]   ;;  %s2179_s11 = smov [#allocation10]  }
   0x5   :  { %s36_s10 = sshll.u32 %s2178_s30, 4  ;;  %s62_s12 = sshll.u32 %s2179_s11, 4  ;;  %s37_s10 = int_to_ptr.vmem [resolvable:$true] %s36_s10  ;;  %s63_s12 = int_to_ptr.vmem [resolvable:$true] %s62_s12 }
   0x6   :  { %s2036_s13 = scalar_lea.vmem %s37_s10, 256  ;;  %p2041_p1 = scmp.lt.s32.totalorder %s37_s10, %s37_s10 }
   0x7   :  { %p2037_p0 = scmp.ne.s32.totalorder %s37_s10, %s2036_s13  ;;  %p2042_p2 = scmp.lt.s32.totalorder %s2036_s13, %s2036_s13 }
   0x9   :  { %p2043_p3 = por %p2042_p2, %p2041_p1 }
   0xb   :  { %p2044_p4 = pnand %p2043_p3, %p2037_p0 }
   0xd   :  { %2047 = shalt.err (!%p2044_p4)
}
   0xe   :  { %s2180_s14 = smov 128   ;;  %s2181_s15 = smov 8  }
   0xf   :  { %42 = dma.hbm_to_vmem [thread:$0]  %s2511_s1, 256, %s37_s10, [#allocation8], %s2180_s14, %s2180_s14, %s2181_s15  }
  0x10   :  { %s2056_s18 = scalar_lea.vmem %s63_s12, 512  ;;  %p2061_p6 = scmp.lt.s32.totalorder %s63_s12, %s63_s12 }
  0x11   :  { %p2057_p5 = scmp.ne.s32.totalorder %s63_s12, %s2056_s18  ;;  %p2062_p7 = scmp.lt.s32.totalorder %s2056_s18, %s2056_s18 }
  0x13   :  { %p2063_p8 = por %p2062_p7, %p2061_p6 }
  0x15   :  { %p2064_p9 = pnand %p2063_p8, %p2057_p5 }
  0x17   :  { %2067 = shalt.err (!%p2064_p9)
}
  0x18   :  { %68 = dma.hbm_to_vmem [thread:$0]  %s2514_s4, 512, %s63_s12, [#allocation11], %s2180_s14, %s2180_s14, %s2181_s15  }
  0x19   :  { %s2182_s21 = smov [#allocation4]   ;;  %s2183_s23 = smov [#allocation9]  }
  0x1a   :  { %s24_s22 = sshll.u32 %s2182_s21, 4  ;;  %s48_s24 = sshll.u32 %s2183_s23, 4  ;;  %s25_s22 = int_to_ptr.vmem [resolvable:$true] %s24_s22  ;;  %s49_s24 = int_to_ptr.vmem [resolvable:$true] %s48_s24 }
  0x1b   :  { %s2076_s1 = scalar_lea.vmem %s25_s22, 256  ;;  %p2081_p11 = scmp.lt.s32.totalorder %s25_s22, %s25_s22 }
  0x1c   :  { %p2077_p10 = scmp.ne.s32.totalorder %s25_s22, %s2076_s1  ;;  %p2082_p12 = scmp.lt.s32.totalorder %s2076_s1, %s2076_s1 }
  0x1e   :  { %p2083_p13 = por %p2082_p12, %p2081_p11 }
  0x20   :  { %p2084_p0 = pnand %p2083_p13, %p2077_p10 }
  0x22   :  { %2087 = shalt.err (!%p2084_p0)
}
  0x23   :  { %30 = dma.hbm_to_vmem [thread:$0]  %s2510_s0, 256, %s25_s22, [#allocation5], %s2180_s14, %s2180_s14, %s2181_s15  }
  0x24   :  { %s2096_s4 = scalar_lea.vmem %s49_s24, 512  ;;  %p2101_p2 = scmp.lt.s32.totalorder %s49_s24, %s49_s24 }
  0x25   :  { %p2097_p1 = scmp.ne.s32.totalorder %s49_s24, %s2096_s4  ;;  %p2102_p3 = scmp.lt.s32.totalorder %s2096_s4, %s2096_s4 }
  0x27   :  { %p2103_p4 = por %p2102_p3, %p2101_p2 }
  0x29   :  { %p2104_p5 = pnand %p2103_p4, %p2097_p1 }
  0x2b   :  { %2107 = shalt.err (!%p2104_p5)
}
  0x2c   :  { %54 = dma.hbm_to_vmem [thread:$0]  %s2512_s2, 512, %s49_s24, [#allocation8], %s2180_s14, %s2180_s14, %s2181_s15  }
  0x2d   :  { %s2184_s29 = smov [#allocation12]   ;;  %s2185_s10 = smov [#allocation13]  }
  0x2e   :  { %s74_s30 = sshll.u32 %s2184_s29, 4  ;;  %s88_s11 = sshll.u32 %s2185_s10, 4  ;;  %s75_s30 = int_to_ptr.vmem [resolvable:$true] %s74_s30  ;;  %s89_s11 = int_to_ptr.vmem [resolvable:$true] %s88_s11 }
  0x2f   :  { %s2116_s0 = scalar_lea.vmem %s75_s30, 512  ;;  %p2121_p7 = scmp.lt.s32.totalorder %s75_s30, %s75_s30 }
  0x30   :  { %p2117_p6 = scmp.ne.s32.totalorder %s75_s30, %s2116_s0  ;;  %p2122_p8 = scmp.lt.s32.totalorder %s2116_s0, %s2116_s0 }
  0x32   :  { %p2123_p9 = por %p2122_p8, %p2121_p7 }
  0x34   :  { %p2124_p10 = pnand %p2123_p9, %p2117_p6 }
  0x36   :  { %2127 = shalt.err (!%p2124_p10)
}
  0x37   :  { %80 = dma.hbm_to_vmem [thread:$0]  %s2515_s5, 512, %s75_s30, [#allocation11], %s2180_s14, %s2180_s14, %s2181_s15  }
  0x38   :  { %s2136_s2 = scalar_lea.vmem %s89_s11, 512  ;;  %p2141_p12 = scmp.lt.s32.totalorder %s89_s11, %s89_s11 }
  0x39   :  { %p2137_p11 = scmp.ne.s32.totalorder %s89_s11, %s2136_s2  ;;  %p2142_p13 = scmp.lt.s32.totalorder %s2136_s2, %s2136_s2 }
  0x3b   :  { %p2143_p0 = por %p2142_p13, %p2141_p12 }
  0x3d   :  { %p2144_p1 = pnand %p2143_p0, %p2137_p11 }
  0x3f   :  { %2147 = shalt.err (!%p2144_p1)
}
  0x40   :  { %94 = dma.hbm_to_vmem [thread:$0]  %s2517_s7, 512, %s89_s11, [#allocation14], %s2180_s14, %s2180_s14, %s2181_s15  }
  0x41   :  { %2168 = dma.done.wait [#allocation5], 256  }
  0x42   :  { %2169 = vsyncadd [#allocation5], 4294967040 }
  0x43   :  { %2170 = dma.done.wait [#allocation8], 768  }
  0x44   :  { %2171 = vsyncadd [#allocation8], 4294966528 }
  0x45   :  { %2172 = dma.done.wait [#allocation11], 1024  }
  0x46   :  { %2173 = vsyncadd [#allocation11], 4294966272 }
  0x47   :  { %2174 = dma.done.wait [#allocation14], 512  }
  0x48   :  { %2175 = vsyncadd [#allocation14], 4294966784  ;;  %v2186_v0 = vmov 0.0   ;;  %vm2187_vm0 = vmmov 0   ;;  %vm130_vm1 = vcmask 130048   ;;  %v116_v1 = vld [vmem:[#allocation7 + $0x8] sm:$0xff] }
  0x49   :  { %1787 = vmatprep.subr.mxu1 %v2186_v0  ;;  %1795 = vmatprep.mubr.msk.f32.mxu1 %vm2187_vm0, %v2186_v0  ;;  %v115_v2 = vld [vmem:[#allocation7] sm:$0xff]  ;;  %v122_v3 = vld [vmem:[#allocation4] sm:$0xff]  ;;  %v2279_v4 = vld [vmem:[#allocation9 + $0x18] sm:$0xff]  ;;  %vm212_vm2 = vcmask 261120   ;;  %vm291_vm3 = vcmask 254976   ;;  %s2188_s20 = smov [#allocation15]  }
  0x4a   :  { %1780 = vmatprep.subr.mxu0 %v116_v1  ;;  %1784 = vmatprep.mubr.msk.f32.mxu0 %vm130_vm1, %v122_v3  ;;  %v2281_v5 = vld [vmem:[#allocation9 + $0x10] sm:$0xff]  ;;  %v123_v6 = vld [vmem:[#allocation4 + $0x8] sm:$0xff]  ;;  %v2290_v8 = vld [vmem:[#allocation9] sm:$0xff]  ;;  %s1646_s21 = sshll.u32 %s2188_s20, 4  ;;  %s1647_s21 = int_to_ptr.vmem [resolvable:$true] %s1646_s21 }
  0x4b   :  { %1781 = vmatpush3.msra.mxu0 %v116_v1  ;;  %1788 = vmatpush3.msra.mxu1 %v2279_v4  ;;  %v2285_v7 = vld [vmem:[#allocation9 + $0x8] sm:$0xff]  ;;  %v1661_v9 = vld [vmem:[%s2513_s3] ss:$0 sm:$0xff]  ;;  %v835_v50 = vld [vmem:[#allocation10 + $0x18] sm:$0xff]  ;;  %s2148_s22 = scalar_lea.vmem %s1647_s21, 256  ;;  %p2153_p3 = scmp.lt.s32.totalorder %s1647_s21, %s1647_s21 }
  0x4c   :  { %1782 = vmatprep.subr.mxu0 %v115_v2  ;;  %1789 = vmatprep.subr.mxu1 %v2186_v0  ;;  %v834_v51 = vld [vmem:[#allocation10 + $0x10] sm:$0xff]  ;;  %v833_v52 = vld [vmem:[#allocation10 + $0x8] sm:$0xff]  ;;  %v832_v53 = vld [vmem:[#allocation10] sm:$0xff]  ;;  %p2149_p2 = scmp.ne.s32.totalorder %s1647_s21, %s2148_s22  ;;  %p2154_p4 = scmp.lt.s32.totalorder %s2148_s22, %s2148_s22 }
  0x4d   :  { %1783 = vmatpush3.msra.mxu0 %v115_v2  ;;  %1790 = vmatpush3.msra.mxu1 %v2281_v5  ;;  %v2389_v54 = vld [vmem:[#allocation12 + $0x18] sm:$0xff]  ;;  %v2391_v55 = vld [vmem:[#allocation12 + $0x10] sm:$0xff]  ;;  %v2396_v56 = vld [vmem:[#allocation12 + $0x8] sm:$0xff] }
  0x4e   :  { %1785 = vmatmul.mubr.msk.f32.vlgmr.msra.gmra.mxu0 %vm130_vm1, %v123_v6  ;;  %1791 = vmatprep.subr.mxu1 %v2186_v0  ;;  %v2400_v57 = vld [vmem:[#allocation12] sm:$0xff]  ;;  %p2155_p5 = por %p2154_p4, %p2153_p3 }
  0x4f   :  { %1792 = vmatpush3.msra.mxu1 %v2285_v7  ;;  %1798 = vmatprep.subr.mxu0 %v2186_v0  ;;  %v1671_v3 = vld [vmem:[%s2516_s6] ss:$0 sm:$0xff] }
  0x50   :  { %1793 = vmatprep.subr.mxu1 %v2186_v0  ;;  %1799 = vmatpush3.msra.mxu0 %v2279_v4  ;;  %p2156_p6 = pnand %p2155_p5, %p2149_p2 }
  0x51   :  { %1794 = vmatpush3.msra.mxu1 %v2290_v8  ;;  %1800 = vmatprep.subr.mxu0 %v2186_v0 }
  0x52   :  { %1796 = vmatmul.mubr.f32.vlgmr.msra.gmra.mxu1 %v2186_v0  ;;  %1801 = vmatpush3.msra.mxu0 %v2281_v5 }
  0x53   :  { %1802 = vmatprep.subr.mxu0 %v2186_v0  ;;  %1806 = vmatprep.mubr.msk.f32.mxu0 %vm2187_vm0, %v2186_v0 }
  0x54   :  { %1803 = vmatpush3.msra.mxu0 %v2285_v7  ;;  %1809 = vmatprep.subr.mxu1 %v2186_v0 }
  0x55   :  { %1804 = vmatprep.subr.mxu0 %v2186_v0  ;;  %1810 = vmatpush3.msra.mxu1 %v2279_v4 }
  0x56   :  { %1805 = vmatpush3.msra.mxu0 %v2290_v8  ;;  %1811 = vmatprep.subr.mxu1 %v2186_v0 }
  0x57   :  { %1812 = vmatpush3.msra.mxu1 %v2281_v5  ;;  %1817 = vmatprep.mubr.msk.f32.mxu1 %vm2187_vm0, %v2186_v0 }
  0x58   :  { %1813 = vmatprep.subr.mxu1 %v2186_v0  ;;  %1820 = vmatprep.subr.mxu0 %v2186_v0 }
  0x59   :  { %1814 = vmatpush3.msra.mxu1 %v2285_v7 }
  0x5a   :  { %1815 = vmatprep.subr.mxu1 %v2186_v0 }
  0x5b   :  { %1816 = vmatpush3.msra.mxu1 %v2290_v8 }
  0x5c   :  { %1831 = vmatprep.subr.mxu1 %v2186_v0 }
 0x10e   :  { %v1786_v10 = vpop.f32.mrf.mxu0 }
 0x10f   :  { %v209_v11 = vadd.f32 %v1786_v10, %v1661_v9 }
 0x110   :  { %v203_v12 = vpop.f32.mrf.mxu0 }
 0x111   :  { %214 = vst.msk [vmem:[#allocation2 + $0x8] sm:$0xff] %vm212_vm2, %v209_v11  ;;  %v204_v13 = vadd.f32 %v1661_v9, %v203_v12 }
 0x112   :  { %v285_v14 = vpop.f32.mrf.mxu1 }
 0x113   :  { %213 = vst.msk [vmem:[#allocation2] sm:$0xff] %vm212_vm2, %v204_v13 }
 0x114   :  { %v1797_v15 = vpop.f32.mrf.mxu1 }
 0x118   :  { %v524_v34 = vld [vmem:[#allocation2 + $0x8] sm:$0x3]  ;;  %v601_v39 = vld [vmem:[#allocation2 + $0xa] sm:$0x3]  ;;  %v678_v45 = vld [vmem:[#allocation2 + $0xc] sm:$0x3] }
 0x119   :  { %v755_v58 = vld [vmem:[#allocation2 + $0xe] sm:$0x3] }
 0x11a   :  { %v215_v16 = vld [vmem:[#allocation2] sm:$0x3]  ;;  %v293_v19 = vld [vmem:[#allocation2 + $0x2] sm:$0x3]  ;;  %v370_v24 = vld [vmem:[#allocation2 + $0x4] sm:$0x3] }
 0x11b   :  { %v289_v17 = vadd.f32 %v285_v14, %v215_v16  ;;  %v447_v29 = vld [vmem:[#allocation2 + $0x6] sm:$0x3] }
 0x11d   :  { %1996 = vtanh.f32 %v289_v17 }
 0x12a   :  { %v1997_v18 = vpop.eup %1996 }
 0x12b   :  { %292 = vst.msk [vmem:[#allocation3] sm:$0x3] %vm291_vm3, %v1997_v18  ;;  %1807 = vmatmul.mubr.msk.f32.vlgmr.msra.gmra.mxu0 %vm212_vm2, %v1997_v18 }
 0x12c   :  { %1821 = vmatpush3.msra.mxu0 %v2279_v4  ;;  %1828 = vmatprep.mubr.msk.f32.mxu0 %vm2187_vm0, %v2186_v0 }
 0x12d   :  { %1822 = vmatprep.subr.mxu0 %v2186_v0 }
 0x12e   :  { %1823 = vmatpush3.msra.mxu0 %v2281_v5 }
 0x12f   :  { %1824 = vmatprep.subr.mxu0 %v2186_v0 }
 0x130   :  { %1825 = vmatpush3.msra.mxu0 %v2285_v7 }
 0x131   :  { %1826 = vmatprep.subr.mxu0 %v2186_v0 }
 0x132   :  { %1827 = vmatpush3.msra.mxu0 %v2290_v8 }
 0x133   :  { %1842 = vmatprep.subr.mxu0 %v2186_v0 }
 0x1eb   :  { %v363_v20 = vpop.f32.mrf.mxu0 }
 0x1ec   :  { %v367_v21 = vadd.f32 %v363_v20, %v293_v19 }
 0x1ed   :  { %v1808_v22 = vpop.f32.mrf.mxu0 }
 0x1ee   :  { %1998 = vtanh.f32 %v367_v21 }
 0x1fb   :  { %v1999_v23 = vpop.eup %1998 }
 0x1fc   :  { %369 = vst.msk [vmem:[#allocation3 + $0x2] sm:$0x3] %vm291_vm3, %v1999_v23  ;;  %1818 = vmatmul.mubr.msk.f32.vlgmr.msra.gmra.mxu1 %vm212_vm2, %v1999_v23 }
 0x1fd   :  { %1832 = vmatpush3.msra.mxu1 %v2279_v4  ;;  %1839 = vmatprep.mubr.msk.f32.mxu1 %vm2187_vm0, %v2186_v0 }
 0x1fe   :  { %1833 = vmatprep.subr.mxu1 %v2186_v0 }
 0x1ff   :  { %1834 = vmatpush3.msra.mxu1 %v2281_v5 }
 0x200   :  { %1835 = vmatprep.subr.mxu1 %v2186_v0 }
 0x201   :  { %1836 = vmatpush3.msra.mxu1 %v2285_v7 }
 0x202   :  { %1837 = vmatprep.subr.mxu1 %v2186_v0 }
 0x203   :  { %1838 = vmatpush3.msra.mxu1 %v2290_v8 }
 0x204   :  { %1853 = vmatprep.subr.mxu1 %v2186_v0 }
 0x2bc   :  { %v440_v25 = vpop.f32.mrf.mxu1 }
 0x2bd   :  { %v444_v26 = vadd.f32 %v440_v25, %v370_v24 }
 0x2be   :  { %v1819_v27 = vpop.f32.mrf.mxu1 }
 0x2bf   :  { %2000 = vtanh.f32 %v444_v26 }
 0x2cc   :  { %v2001_v28 = vpop.eup %2000 }
 0x2cd   :  { %446 = vst.msk [vmem:[#allocation3 + $0x4] sm:$0x3] %vm291_vm3, %v2001_v28  ;;  %1829 = vmatmul.mubr.msk.f32.vlgmr.msra.gmra.mxu0 %vm212_vm2, %v2001_v28 }
 0x2ce   :  { %1843 = vmatpush3.msra.mxu0 %v2279_v4  ;;  %1850 = vmatprep.mubr.msk.f32.mxu0 %vm2187_vm0, %v2186_v0 }
 0x2cf   :  { %1844 = vmatprep.subr.mxu0 %v2186_v0 }
 0x2d0   :  { %1845 = vmatpush3.msra.mxu0 %v2281_v5 }
 0x2d1   :  { %1846 = vmatprep.subr.mxu0 %v2186_v0 }
 0x2d2   :  { %1847 = vmatpush3.msra.mxu0 %v2285_v7 }
 0x2d3   :  { %1848 = vmatprep.subr.mxu0 %v2186_v0 }
 0x2d4   :  { %1849 = vmatpush3.msra.mxu0 %v2290_v8 }
 0x2d5   :  { %1864 = vmatprep.subr.mxu0 %v2186_v0 }
 0x38d   :  { %v517_v30 = vpop.f32.mrf.mxu0 }
 0x38e   :  { %v521_v31 = vadd.f32 %v517_v30, %v447_v29 }
 0x38f   :  { %v1830_v32 = vpop.f32.mrf.mxu0 }
 0x390   :  { %2002 = vtanh.f32 %v521_v31 }
 0x39d   :  { %v2003_v33 = vpop.eup %2002 }
 0x39e   :  { %523 = vst.msk [vmem:[#allocation3 + $0x6] sm:$0x3] %vm291_vm3, %v2003_v33  ;;  %1840 = vmatmul.mubr.msk.f32.vlgmr.msra.gmra.mxu1 %vm212_vm2, %v2003_v33 }
 0x39f   :  { %1854 = vmatpush3.msra.mxu1 %v2279_v4  ;;  %1861 = vmatprep.mubr.msk.f32.mxu1 %vm2187_vm0, %v2186_v0 }
 0x3a0   :  { %1855 = vmatprep.subr.mxu1 %v2186_v0 }
 0x3a1   :  { %1856 = vmatpush3.msra.mxu1 %v2281_v5 }
 0x3a2   :  { %1857 = vmatprep.subr.mxu1 %v2186_v0 }
 0x3a3   :  { %1858 = vmatpush3.msra.mxu1 %v2285_v7 }
 0x3a4   :  { %1859 = vmatprep.subr.mxu1 %v2186_v0 }
 0x3a5   :  { %1860 = vmatpush3.msra.mxu1 %v2290_v8  ;;  %v841_v44 = vld [vmem:[#allocation3] sm:$0xff] }
 0x3a6   :  { %1875 = vmatprep.subr.mxu1 %v835_v50 }
 0x45e   :  { %v594_v35 = vpop.f32.mrf.mxu1 }
 0x45f   :  { %v598_v36 = vadd.f32 %v594_v35, %v524_v34 }
 0x460   :  { %v1841_v37 = vpop.f32.mrf.mxu1 }
 0x461   :  { %2004 = vtanh.f32 %v598_v36 }
 0x46e   :  { %v2005_v38 = vpop.eup %2004 }
 0x46f   :  { %600 = vst.msk [vmem:[#allocation3 + $0x8] sm:$0x3] %vm291_vm3, %v2005_v38  ;;  %1851 = vmatmul.mubr.msk.f32.vlgmr.msra.gmra.mxu0 %vm212_vm2, %v2005_v38 }
 0x470   :  { %1865 = vmatpush3.msra.mxu0 %v2279_v4  ;;  %1872 = vmatprep.mubr.msk.f32.mxu0 %vm2187_vm0, %v2186_v0 }
 0x471   :  { %1866 = vmatprep.subr.mxu0 %v2186_v0 }
 0x472   :  { %1867 = vmatpush3.msra.mxu0 %v2281_v5 }
 0x473   :  { %1868 = vmatprep.subr.mxu0 %v2186_v0 }
 0x474   :  { %1869 = vmatpush3.msra.mxu0 %v2285_v7 }
 0x475   :  { %1870 = vmatprep.subr.mxu0 %v2186_v0 }
 0x476   :  { %1871 = vmatpush3.msra.mxu0 %v2290_v8 }
 0x477   :  { %1886 = vmatprep.subr.mxu0 %v2186_v0 }
 0x52f   :  { %v671_v40 = vpop.f32.mrf.mxu0 }
 0x530   :  { %v675_v41 = vadd.f32 %v671_v40, %v601_v39 }
 0x531   :  { %v1852_v42 = vpop.f32.mrf.mxu0 }
 0x532   :  { %2006 = vtanh.f32 %v675_v41  ;;  %v1550_v41 = vld [vmem:[#allocation13 + $0x18] sm:$0xff]  ;;  %v1549_v42 = vld [vmem:[#allocation13 + $0x10] sm:$0xff] }
 0x53f   :  { %v2007_v43 = vpop.eup %2006 }
 0x540   :  { %677 = vst.msk [vmem:[#allocation3 + $0xa] sm:$0x3] %vm291_vm3, %v2007_v43  ;;  %1862 = vmatmul.mubr.msk.f32.vlgmr.msra.gmra.mxu1 %vm212_vm2, %v2007_v43  ;;  %v1548_v43 = vld [vmem:[#allocation13 + $0x8] sm:$0xff] }
 0x541   :  { %1883 = vmatprep.mubr.msk.f32.mxu1 %vm212_vm2, %v841_v44  ;;  %1876 = vmatpush3.msra.mxu1 %v835_v50  ;;  %v1547_v44 = vld [vmem:[#allocation13] sm:$0xff] }
 0x542   :  { %1877 = vmatprep.subr.mxu1 %v834_v51 }
 0x543   :  { %1878 = vmatpush3.msra.mxu1 %v834_v51  ;;  %v1681_v51 = vld [vmem:[%s2518_s8] ss:$0 sm:$0xff] }
 0x544   :  { %1879 = vmatprep.subr.mxu1 %v833_v52 }
 0x545   :  { %1880 = vmatpush3.msra.mxu1 %v833_v52 }
 0x546   :  { %1881 = vmatprep.subr.mxu1 %v832_v53 }
 0x547   :  { %1882 = vmatpush3.msra.mxu1 %v832_v53 }
 0x548   :  { %1897 = vmatprep.subr.mxu1 %v2186_v0 }
 0x600   :  { %v748_v46 = vpop.f32.mrf.mxu1 }
 0x601   :  { %v752_v47 = vadd.f32 %v748_v46, %v678_v45 }
 0x602   :  { %v1863_v48 = vpop.f32.mrf.mxu1 }
 0x603   :  { %2008 = vtanh.f32 %v752_v47 }
 0x610   :  { %v2009_v49 = vpop.eup %2008 }
 0x611   :  { %754 = vst.msk [vmem:[#allocation3 + $0xc] sm:$0x3] %vm291_vm3, %v2009_v49  ;;  %1873 = vmatmul.mubr.msk.f32.vlgmr.msra.gmra.mxu0 %vm212_vm2, %v2009_v49 }
 0x612   :  { %1894 = vmatprep.mubr.msk.f32.mxu0 %vm2187_vm0, %v2186_v0  ;;  %1887 = vmatpush3.msra.mxu0 %v2389_v54 }
 0x613   :  { %1888 = vmatprep.subr.mxu0 %v2186_v0 }
 0x614   :  { %1889 = vmatpush3.msra.mxu0 %v2391_v55 }
 0x615   :  { %1890 = vmatprep.subr.mxu0 %v2186_v0 }
 0x616   :  { %1891 = vmatpush3.msra.mxu0 %v2396_v56 }
 0x617   :  { %1892 = vmatprep.subr.mxu0 %v2186_v0 }
 0x618   :  { %1893 = vmatpush3.msra.mxu0 %v2400_v57 }
 0x619   :  { %1895 = vmatmul.mubr.f32.vlgmr.msra.gmra.mxu0 %v2186_v0  ;;  %1908 = vmatprep.subr.mxu0 %v2186_v0 }
 0x61a   :  { %1909 = vmatpush3.msra.mxu0 %v2389_v54  ;;  %1916 = vmatprep.mubr.msk.f32.mxu0 %vm2187_vm0, %v2186_v0 }
 0x61b   :  { %1910 = vmatprep.subr.mxu0 %v2186_v0 }
 0x61c   :  { %1911 = vmatpush3.msra.mxu0 %v2391_v55 }
 0x61d   :  { %1912 = vmatprep.subr.mxu0 %v2186_v0 }
 0x61e   :  { %1913 = vmatpush3.msra.mxu0 %v2396_v56 }
 0x61f   :  { %1914 = vmatprep.subr.mxu0 %v2186_v0 }
 0x620   :  { %1915 = vmatpush3.msra.mxu0 %v2400_v57 }
 0x621   :  { %1930 = vmatprep.subr.mxu0 %v2186_v0 }
 0x6d1   :  { %v825_v59 = vpop.f32.mrf.mxu0 }
 0x6d2   :  { %v829_v60 = vadd.f32 %v825_v59, %v755_v58 }
 0x6d3   :  { %v1874_v61 = vpop.f32.mrf.mxu0 }
 0x6d4   :  { %2010 = vtanh.f32 %v829_v60 }
 0x6d9   :  { %v999_v1 = vpop.f32.mrf.mxu0 }
 0x6db   :  { %v1896_v2 = vpop.f32.mrf.mxu0 }
 0x6e1   :  { %v2011_v62 = vpop.eup %2010 }
 0x6e2   :  { %831 = vst.msk [vmem:[#allocation3 + $0xe] sm:$0x3] %vm291_vm3, %v2011_v62 }
 0x6e9   :  { %v842_v63 = vld [vmem:[#allocation3 + $0x8] sm:$0xff] }
 0x6ea   :  { %1884 = vmatmul.mubr.msk.f32.vlgmr.msra.gmra.mxu1 %vm212_vm2, %v842_v63 }
 0x6eb   :  { %1898 = vmatpush3.msra.mxu1 %v2389_v54  ;;  %1905 = vmatprep.mubr.msk.f32.mxu1 %vm2187_vm0, %v2186_v0 }
 0x6ec   :  { %1899 = vmatprep.subr.mxu1 %v2186_v0 }
 0x6ed   :  { %1900 = vmatpush3.msra.mxu1 %v2391_v55 }
 0x6ee   :  { %1901 = vmatprep.subr.mxu1 %v2186_v0 }
 0x6ef   :  { %1902 = vmatpush3.msra.mxu1 %v2396_v56 }
 0x6f0   :  { %1903 = vmatprep.subr.mxu1 %v2186_v0 }
 0x6f1   :  { %1904 = vmatpush3.msra.mxu1 %v2400_v57 }
 0x6f2   :  { %1919 = vmatprep.subr.mxu1 %v2186_v0 }
 0x7aa   :  { %v1885_v4 = vpop.f32.mrf.mxu1 }
 0x7ab   :  { %v927_v5 = vadd.f32 %v1885_v4, %v1671_v3 }
 0x7ac   :  { %v921_v6 = vpop.f32.mrf.mxu1 }
 0x7ad   :  { %931 = vst.msk [vmem:[#allocation2 + $0x8] sm:$0xff] %vm212_vm2, %v927_v5  ;;  %v922_v7 = vadd.f32 %v1671_v3, %v921_v6 }
 0x7af   :  { %930 = vst.msk [vmem:[#allocation2] sm:$0xff] %vm212_vm2, %v922_v7 }
 0x7b4   :  { %v1237_v26 = vld [vmem:[#allocation2 + $0x8] sm:$0x3]  ;;  %v1314_v31 = vld [vmem:[#allocation2 + $0xa] sm:$0x3]  ;;  %v1391_v37 = vld [vmem:[#allocation2 + $0xc] sm:$0x3] }
 0x7b5   :  { %v1468_v45 = vld [vmem:[#allocation2 + $0xe] sm:$0x3] }
 0x7b6   :  { %v932_v8 = vld [vmem:[#allocation2] sm:$0x3]  ;;  %v1006_v11 = vld [vmem:[#allocation2 + $0x2] sm:$0x3]  ;;  %v1083_v16 = vld [vmem:[#allocation2 + $0x4] sm:$0x3] }
 0x7b7   :  { %v1003_v9 = vadd.f32 %v999_v1, %v932_v8  ;;  %v1160_v21 = vld [vmem:[#allocation2 + $0x6] sm:$0x3] }
 0x7b9   :  { %2012 = vtanh.f32 %v1003_v9 }
 0x7c6   :  { %v2013_v10 = vpop.eup %2012 }
 0x7c7   :  { %1005 = vst.msk [vmem:[#allocation3] sm:$0x3] %vm291_vm3, %v2013_v10  ;;  %1906 = vmatmul.mubr.msk.f32.vlgmr.msra.gmra.mxu1 %vm212_vm2, %v2013_v10 }
 0x7c8   :  { %1920 = vmatpush3.msra.mxu1 %v2389_v54  ;;  %1927 = vmatprep.mubr.msk.f32.mxu1 %vm2187_vm0, %v2186_v0 }
 0x7c9   :  { %1921 = vmatprep.subr.mxu1 %v2186_v0 }
 0x7ca   :  { %1922 = vmatpush3.msra.mxu1 %v2391_v55 }
 0x7cb   :  { %1923 = vmatprep.subr.mxu1 %v2186_v0 }
 0x7cc   :  { %1924 = vmatpush3.msra.mxu1 %v2396_v56 }
 0x7cd   :  { %1925 = vmatprep.subr.mxu1 %v2186_v0 }
 0x7ce   :  { %1926 = vmatpush3.msra.mxu1 %v2400_v57 }
 0x7cf   :  { %1941 = vmatprep.subr.mxu1 %v2186_v0 }
 0x887   :  { %v1076_v12 = vpop.f32.mrf.mxu1 }
 0x888   :  { %v1080_v13 = vadd.f32 %v1076_v12, %v1006_v11 }
 0x889   :  { %v1907_v14 = vpop.f32.mrf.mxu1 }
 0x88a   :  { %2014 = vtanh.f32 %v1080_v13 }
 0x897   :  { %v2015_v15 = vpop.eup %2014 }
 0x898   :  { %1082 = vst.msk [vmem:[#allocation3 + $0x2] sm:$0x3] %vm291_vm3, %v2015_v15  ;;  %1917 = vmatmul.mubr.msk.f32.vlgmr.msra.gmra.mxu0 %vm212_vm2, %v2015_v15 }
 0x899   :  { %1931 = vmatpush3.msra.mxu0 %v2389_v54  ;;  %1938 = vmatprep.mubr.msk.f32.mxu0 %vm2187_vm0, %v2186_v0 }
 0x89a   :  { %1932 = vmatprep.subr.mxu0 %v2186_v0 }
 0x89b   :  { %1933 = vmatpush3.msra.mxu0 %v2391_v55 }
 0x89c   :  { %1934 = vmatprep.subr.mxu0 %v2186_v0 }
 0x89d   :  { %1935 = vmatpush3.msra.mxu0 %v2396_v56 }
 0x89e   :  { %1936 = vmatprep.subr.mxu0 %v2186_v0 }
 0x89f   :  { %1937 = vmatpush3.msra.mxu0 %v2400_v57 }
 0x8a0   :  { %1952 = vmatprep.subr.mxu0 %v2186_v0 }
 0x958   :  { %v1153_v17 = vpop.f32.mrf.mxu0 }
 0x959   :  { %v1157_v18 = vadd.f32 %v1153_v17, %v1083_v16 }
 0x95a   :  { %v1918_v19 = vpop.f32.mrf.mxu0 }
 0x95b   :  { %2016 = vtanh.f32 %v1157_v18 }
 0x968   :  { %v2017_v20 = vpop.eup %2016 }
 0x969   :  { %1159 = vst.msk [vmem:[#allocation3 + $0x4] sm:$0x3] %vm291_vm3, %v2017_v20  ;;  %1928 = vmatmul.mubr.msk.f32.vlgmr.msra.gmra.mxu1 %vm212_vm2, %v2017_v20 }
 0x96a   :  { %1942 = vmatpush3.msra.mxu1 %v2389_v54  ;;  %1949 = vmatprep.mubr.msk.f32.mxu1 %vm2187_vm0, %v2186_v0 }
 0x96b   :  { %1943 = vmatprep.subr.mxu1 %v2186_v0 }
 0x96c   :  { %1944 = vmatpush3.msra.mxu1 %v2391_v55 }
 0x96d   :  { %1945 = vmatprep.subr.mxu1 %v2186_v0 }
 0x96e   :  { %1946 = vmatpush3.msra.mxu1 %v2396_v56 }
 0x96f   :  { %1947 = vmatprep.subr.mxu1 %v2186_v0 }
 0x970   :  { %1948 = vmatpush3.msra.mxu1 %v2400_v57 }
 0x971   :  { %1963 = vmatprep.subr.mxu1 %v2186_v0 }
 0xa29   :  { %v1230_v22 = vpop.f32.mrf.mxu1 }
 0xa2a   :  { %v1234_v23 = vadd.f32 %v1230_v22, %v1160_v21 }
 0xa2b   :  { %v1929_v24 = vpop.f32.mrf.mxu1 }
 0xa2c   :  { %2018 = vtanh.f32 %v1234_v23 }
 0xa39   :  { %v2019_v25 = vpop.eup %2018 }
 0xa3a   :  { %1236 = vst.msk [vmem:[#allocation3 + $0x6] sm:$0x3] %vm291_vm3, %v2019_v25  ;;  %1939 = vmatmul.mubr.msk.f32.vlgmr.msra.gmra.mxu0 %vm212_vm2, %v2019_v25 }
 0xa3b   :  { %1953 = vmatpush3.msra.mxu0 %v2389_v54  ;;  %1960 = vmatprep.mubr.msk.f32.mxu0 %vm2187_vm0, %v2186_v0 }
 0xa3c   :  { %1954 = vmatprep.subr.mxu0 %v2186_v0 }
 0xa3d   :  { %1955 = vmatpush3.msra.mxu0 %v2391_v55 }
 0xa3e   :  { %1956 = vmatprep.subr.mxu0 %v2186_v0 }
 0xa3f   :  { %1957 = vmatpush3.msra.mxu0 %v2396_v56 }
 0xa40   :  { %1958 = vmatprep.subr.mxu0 %v2186_v0 }
 0xa41   :  { %1959 = vmatpush3.msra.mxu0 %v2400_v57  ;;  %v1545_v36 = vld [vmem:[#allocation3] sm:$0xff] }
 0xa42   :  { %1974 = vmatprep.subr.mxu0 %v1550_v41 }
 0xafa   :  { %v1307_v27 = vpop.f32.mrf.mxu0 }
 0xafb   :  { %v1311_v28 = vadd.f32 %v1307_v27, %v1237_v26 }
 0xafc   :  { %v1940_v29 = vpop.f32.mrf.mxu0 }
 0xafd   :  { %2020 = vtanh.f32 %v1311_v28 }
 0xb0a   :  { %v2021_v30 = vpop.eup %2020 }
 0xb0b   :  { %1313 = vst.msk [vmem:[#allocation3 + $0x8] sm:$0x3] %vm291_vm3, %v2021_v30  ;;  %1950 = vmatmul.mubr.msk.f32.vlgmr.msra.gmra.mxu1 %vm212_vm2, %v2021_v30 }
 0xb0c   :  { %1964 = vmatpush3.msra.mxu1 %v2389_v54  ;;  %1971 = vmatprep.mubr.msk.f32.mxu1 %vm2187_vm0, %v2186_v0 }
 0xb0d   :  { %1965 = vmatprep.subr.mxu1 %v2186_v0 }
 0xb0e   :  { %1966 = vmatpush3.msra.mxu1 %v2391_v55 }
 0xb0f   :  { %1967 = vmatprep.subr.mxu1 %v2186_v0 }
 0xb10   :  { %1968 = vmatpush3.msra.mxu1 %v2396_v56 }
 0xb11   :  { %1969 = vmatprep.subr.mxu1 %v2186_v0 }
 0xb12   :  { %1970 = vmatpush3.msra.mxu1 %v2400_v57 }
 0xbcb   :  { %v1384_v32 = vpop.f32.mrf.mxu1 }
 0xbcc   :  { %v1388_v33 = vadd.f32 %v1384_v32, %v1314_v31 }
 0xbcd   :  { %v1951_v34 = vpop.f32.mrf.mxu1 }
 0xbce   :  { %2022 = vtanh.f32 %v1388_v33 }
 0xbdb   :  { %v2023_v35 = vpop.eup %2022 }
 0xbdc   :  { %1390 = vst.msk [vmem:[#allocation3 + $0xa] sm:$0x3] %vm291_vm3, %v2023_v35  ;;  %1961 = vmatmul.mubr.msk.f32.vlgmr.msra.gmra.mxu0 %vm212_vm2, %v2023_v35 }
 0xbdd   :  { %1982 = vmatprep.mubr.msk.f32.mxu0 %vm212_vm2, %v1545_v36  ;;  %1975 = vmatpush3.msra.mxu0 %v1550_v41 }
 0xbde   :  { %1976 = vmatprep.subr.mxu0 %v1549_v42 }
 0xbdf   :  { %1977 = vmatpush3.msra.mxu0 %v1549_v42 }
 0xbe0   :  { %1978 = vmatprep.subr.mxu0 %v1548_v43 }
 0xbe1   :  { %1979 = vmatpush3.msra.mxu0 %v1548_v43 }
 0xbe2   :  { %1980 = vmatprep.subr.mxu0 %v1547_v44 }
 0xbe3   :  { %1981 = vmatpush3.msra.mxu0 %v1547_v44 }
 0xc9c   :  { %v1461_v38 = vpop.f32.mrf.mxu0 }
 0xc9d   :  { %v1465_v39 = vadd.f32 %v1461_v38, %v1391_v37 }
 0xc9e   :  { %v1962_v40 = vpop.f32.mrf.mxu0 }
 0xc9f   :  { %2024 = vtanh.f32 %v1465_v39 }
 0xcac   :  { %v2025_v0 = vpop.eup %2024 }
 0xcad   :  { %1467 = vst.msk [vmem:[#allocation3 + $0xc] sm:$0x3] %vm291_vm3, %v2025_v0  ;;  %1972 = vmatmul.mubr.msk.f32.vlgmr.msra.gmra.mxu1 %vm212_vm2, %v2025_v0 }
 0xd6d   :  { %v1538_v46 = vpop.f32.mrf.mxu1 }
 0xd6e   :  { %v1542_v47 = vadd.f32 %v1538_v46, %v1468_v45 }
 0xd6f   :  { %v1973_v48 = vpop.f32.mrf.mxu1 }
 0xd70   :  { %2026 = vtanh.f32 %v1542_v47 }
 0xd7d   :  { %v2027_v49 = vpop.eup %2026 }
 0xd7e   :  { %1544 = vst.msk [vmem:[#allocation3 + $0xe] sm:$0x3] %vm291_vm3, %v2027_v49 }
 0xd85   :  { %v1546_v50 = vld [vmem:[#allocation3 + $0x8] sm:$0xff] }
 0xd86   :  { %1983 = vmatmul.mubr.msk.f32.vlgmr.msra.gmra.mxu0 %vm212_vm2, %v1546_v50 }
 0xe46   :  { %v1984_v52 = vpop.f32.mrf.mxu0 }
 0xe47   :  { %v1636_v53 = vadd.f32 %v1984_v52, %v1681_v51 }
 0xe48   :  { %v1630_v54 = vpop.f32.mrf.mxu0 }
 0xe49   :  { %1640 = vst.msk [vmem:[#allocation15 + $0x8] sm:$0xff] %vm212_vm2, %v1636_v53  ;;  %v1631_v55 = vadd.f32 %v1681_v51, %v1630_v54 }
 0xe4b   :  { %1639 = vst.msk [vmem:[#allocation15] sm:$0xff] %vm212_vm2, %v1631_v55 }
 0xe4c   :  { %2159 = shalt.err (!%p2156_p6)
}
 0xe4d   :  { %1652 = dma.vmem_to_hbm [thread:$0]  %s1647_s21, 256, %s2519_s9, [#allocation6], %s2180_s14, %s2180_s14, %s2181_s15  }
 0xe4e   :  { %2176 = dma.done.wait [#allocation6], 256  }
 0xe4f   :  { %2177 = vsyncadd [#allocation6], 4294967040 }
 0xe50   :  { %1656 = vsyncpa [#allocation5], 1 }
 0xe51   :  { %1657 = vsyncpa [#allocation8], 1 }
 0xe52   :  { %1658 = vsyncpa [#allocation11], 1 }
 0xe53   :  { %1659 = vsyncpa [#allocation14], 1 }
 0xe54   :  { %1660 = vsyncpa [#allocation6], 1 }

</bundles_post_ra>
